<compile_context>
chip_gen: v5e
topology: v5e:2x2
jax: 0.10.0
libtpu: 0.0.40
codegen_flags: <defaults>
</compile_context>

<pallas_src>
import functools

import jax
import jax.numpy as jnp
from jax.experimental import pallas as pl
from jax.experimental.pallas import tpu as pltpu


def _prenorm_kernel(x_ref, w_ref, wb_ref, o_ref, *, eps):
    # x_ref : (1, C, TN)  channels on sublanes, pixels on lanes
    # w_ref : (C, C)      fused weight  W_f = conv_w * g^T   [out, in]
    # wb_ref: (C, 1)      fused bias    b_f = conv_w @ b + conv_b
    x = x_ref[0].astype(jnp.float32)                              # (C, TN)

    # Channel LayerNorm statistics: single-pass, reduction along sublanes.
    mean = jnp.mean(x, axis=0, keepdims=True)                     # (1, TN)
    ex2 = jnp.mean(x * x, axis=0, keepdims=True)                  # (1, TN)
    var = jnp.maximum(ex2 - mean * mean, 0.0)                     # unbiased=False
    inv = jax.lax.rsqrt(var + eps)
    normed = (x - mean) * inv                                     # affine folded into W_f

    # fn: 1x1 conv == (C_out, C_in) @ (C_in, TN); lane-dense MXU output.
    w = w_ref[...]
    y = jnp.dot(w, normed.astype(w.dtype), preferred_element_type=jnp.float32)
    o_ref[0] = (y + wb_ref[...]).astype(o_ref.dtype)


def _pick_tile_lanes(hw, max_lanes):
    """Lane tile: multiple of 128, <= hw, <= max_lanes (full row if hw <= 128)."""
    if hw <= 128:
        return hw
    cap = max(128, (max_lanes // 128) * 128)
    return min(cap, (hw // 128) * 128)


def _shrink_128(tn):
    return max(128, ((tn // 2) // 128) * 128)


def prenorm_conv1x1(x_nchw, g, b, conv_w, conv_b, *, eps=1e-5,
                    max_tile_lanes=8192, matmul_dtype=None):
    """PreNorm(dim, Conv2d(dim, dim, 1)).forward for NCHW input.

    x_nchw: (B, C, H, W); g, b: (1, C, 1, 1); conv_w: (C, C) [out, in]; conv_b: (C,).
    """
    B, C, H, W = x_nchw.shape
    HW = H * W
    x3 = x_nchw.reshape(B, C, HW)          # pure reshape, no HBM transpose

    # ---- fold the LayerNorm affine (g, b) into the 1x1 conv (done once) ----
    g_vec = g.reshape(C).astype(jnp.float32)
    b_vec = b.reshape(C).astype(jnp.float32)
    w32 = conv_w.astype(jnp.float32)
    w_f = w32 * g_vec[None, :]                                   # scale columns by g
    bias_f = (w32 @ b_vec + conv_b.astype(jnp.float32)).reshape(C, 1)

    if matmul_dtype is None:
        # bf16 weights once the matmul matters (C >= 128); exact f32 at tiny C.
        matmul_dtype = jnp.bfloat16 if C >= 128 else jnp.float32
    w_f = w_f.astype(matmul_dtype)

    # ---- generation-aware VMEM budget (v7x has 64 MiB, v5e/v6e 128 MiB) ----
    try:
        vmem_cap = int(pltpu.get_tpu_info().vmem_capacity_bytes)
    except Exception:
        vmem_cap = 64 * 1024 * 1024
    vmem_budget = min(48 * 1024 * 1024, (vmem_cap * 5) // 8)     # ~40 MiB on v7x

    in_item = x_nchw.dtype.itemsize
    w_item = jnp.dtype(matmul_dtype).itemsize
    const_bytes = 2 * (C * C * w_item + C * 4)                   # W + fused bias

    def vmem_need(tn):
        io = 4 * C * tn * in_item            # double-buffered input + output tiles
        inter = 5 * C * tn * 4               # in-kernel f32 intermediates
        return io + inter + const_bytes + (2 << 20)

    tn = _pick_tile_lanes(HW, max_tile_lanes)
    while tn > 128 and vmem_need(tn) > vmem_budget:
        tn = _shrink_128(tn)
    n_tiles = pl.cdiv(HW, tn)

    # v7x megacore: make sure both TensorCores get at least one block.
    if B * n_tiles < 2 and tn > 128:
        tn = _shrink_128(tn)
        n_tiles = pl.cdiv(HW, tn)

    vmem_limit = int(min(max(vmem_need(tn), 16 * 1024 * 1024),
                         max(vmem_cap - (8 << 20), 16 * 1024 * 1024)))

    # Constant operands: second pipeline buffer is pure VMEM waste; only worth
    # requesting when the weight is big enough to matter.
    const_kw = {"pipeline_mode": pl.Buffered(1)} if C >= 256 else {}
    w_spec = pl.BlockSpec((C, C), lambda bi, ji: (0, 0), **const_kw)
    wb_spec = pl.BlockSpec((C, 1), lambda bi, ji: (0, 0), **const_kw)

    out3 = pl.pallas_call(
        functools.partial(_prenorm_kernel, eps=eps),
        out_shape=jax.ShapeDtypeStruct((B, C, HW), x_nchw.dtype),
        grid_spec=pltpu.PrefetchScalarGridSpec(
            num_scalar_prefetch=0,
            grid=(B, n_tiles),
            in_specs=[
                pl.BlockSpec((1, C, tn), lambda bi, ji: (bi, 0, ji)),  # x tile
                w_spec,                                                # fused conv W
                wb_spec,                                               # fused bias
            ],
            out_specs=pl.BlockSpec((1, C, tn), lambda bi, ji: (bi, 0, ji)),
        ),
        compiler_params=pltpu.CompilerParams(
            dimension_semantics=("parallel", "parallel"),
            vmem_limit_bytes=vmem_limit),
    )(x3, w_f, bias_f)

    return out3.reshape(B, C, H, W)        # pure reshape, no HBM transpose


def prenorm_conv1x1_ref(x, g, b, conv_w, conv_b, eps=1e-5):
    # Pure-JAX reference mirroring the PyTorch module semantics.
    mean = jnp.mean(x, axis=1, keepdims=True)
    var = jnp.mean((x - mean) ** 2, axis=1, keepdims=True)   # unbiased=False
    normed = (x - mean) / jnp.sqrt(var + eps) * g + b
    y = jnp.einsum("oc,bchw->bohw", conv_w, normed) + conv_b.reshape(1, -1, 1, 1)
    return y


if __name__ == "__main__":
    key = jax.random.PRNGKey(0)
    B, C, H, W = 2, 32, 16, 16     # dim = 32

    kx, kw, kb, kg, kbeta = jax.random.split(key, 5)
    x = jax.random.normal(kx, (B, C, H, W), dtype=jnp.float32)

    # LayerNorm params (non-trivial values to exercise the g/b -> conv fold).
    g = 1.0 + 0.1 * jax.random.normal(kg, (1, C, 1, 1), dtype=jnp.float32)
    b = 0.1 * jax.random.normal(kbeta, (1, C, 1, 1), dtype=jnp.float32)

    # Deterministic synthetic weights for the wrapped fn (1x1 conv, dim -> dim).
    conv_w = jax.random.normal(kw, (C, C), dtype=jnp.float32) * 0.05
    conv_b = jax.random.normal(kb, (C,), dtype=jnp.float32) * 0.01

    out = prenorm_conv1x1(x, g, b, conv_w, conv_b)
    out = jax.block_until_ready(out)

    ref = prenorm_conv1x1_ref(x, g, b, conv_w, conv_b)
    assert out.shape == (B, C, H, W)
    assert jnp.allclose(out, ref, atol=1e-4, rtol=1e-4), "mismatch vs reference"

    print("KERNEL_OK")
</pallas_src>

<mosaic_0001>
module attributes {stable_mosaic.version = 11 : i64} {
  func.func @_prenorm_kernel(%arg0: i32, %arg1: i32, %arg2: memref<1x32x256xf32, #tpu.memory_space<vmem>>, %arg3: memref<32x32xf32, #tpu.memory_space<vmem>>, %arg4: memref<32x1xf32, #tpu.memory_space<vmem>>, %arg5: memref<1x32x256xf32, #tpu.memory_space<vmem>>) attributes {dimension_semantics = [#tpu.dimension_semantics<parallel>, #tpu.dimension_semantics<parallel>], iteration_bounds = array<i64: 2, 1>, scalar_prefetch = 0 : i64, scratch_operands = 0 : i64, tpu.core_type = #tpu.core_type<tc>, window_params = [{transform_indices = @transform_0, window_bounds = array<i64: 1, 32, 256>}, {pipeline_mode = #tpu.pipeline_mode<synchronous>, transform_indices = @transform_1, window_bounds = array<i64: 32, 32>}, {pipeline_mode = #tpu.pipeline_mode<synchronous>, transform_indices = @transform_2, window_bounds = array<i64: 32, 1>}, {transform_indices = @transform_3, window_bounds = array<i64: 1, 32, 256>}]} {
    %c0 = arith.constant 0 : index
    %c0_0 = arith.constant 0 : index
    %c0_1 = arith.constant 0 : index
    %0 = vector.load %arg2[%c0, %c0_0, %c0_1] : memref<1x32x256xf32, #tpu.memory_space<vmem>>, vector<1x32x256xf32>
    %1 = vector.shape_cast %0 : vector<1x32x256xf32> to vector<32x256xf32>
    %cst = arith.constant dense<0.000000e+00> : vector<256xf32>
    %2 = vector.multi_reduction <add>, %1, %cst [0] : vector<32x256xf32> to vector<256xf32>
    %3 = vector.shape_cast %2 : vector<256xf32> to vector<1x256xf32>
    %cst_2 = arith.constant 3.200000e+01 : f32
    %4 = vector.broadcast %cst_2 : f32 to vector<1x256xf32>
    %5 = arith.divf %3, %4 : vector<1x256xf32>
    %6 = arith.mulf %1, %1 : vector<32x256xf32>
    %cst_3 = arith.constant dense<0.000000e+00> : vector<256xf32>
    %7 = vector.multi_reduction <add>, %6, %cst_3 [0] : vector<32x256xf32> to vector<256xf32>
    %8 = vector.shape_cast %7 : vector<256xf32> to vector<1x256xf32>
    %cst_4 = arith.constant 3.200000e+01 : f32
    %9 = vector.broadcast %cst_4 : f32 to vector<1x256xf32>
    %10 = arith.divf %8, %9 : vector<1x256xf32>
    %11 = arith.mulf %5, %5 : vector<1x256xf32>
    %12 = arith.subf %10, %11 : vector<1x256xf32>
    %cst_5 = arith.constant 0.000000e+00 : f32
    %13 = vector.broadcast %cst_5 : f32 to vector<1x256xf32>
    %14 = arith.maximumf %12, %13 : vector<1x256xf32>
    %cst_6 = arith.constant 9.99999974E-6 : f32
    %15 = vector.broadcast %cst_6 : f32 to vector<1x256xf32>
    %16 = arith.addf %14, %15 : vector<1x256xf32>
    %17 = math.rsqrt %16 : vector<1x256xf32>
    %18 = vector.broadcast %5 : vector<1x256xf32> to vector<32x256xf32>
    %19 = arith.subf %1, %18 : vector<32x256xf32>
    %20 = vector.broadcast %17 : vector<1x256xf32> to vector<32x256xf32>
    %21 = arith.mulf %19, %20 : vector<32x256xf32>
    %c0_7 = arith.constant 0 : index
    %c0_8 = arith.constant 0 : index
    %22 = vector.load %arg3[%c0_7, %c0_8] : memref<32x32xf32, #tpu.memory_space<vmem>>, vector<32x32xf32>
    %cst_9 = arith.constant dense<0.000000e+00> : vector<32x256xf32>
    %23 = tpu.matmul %22, %21, %cst_9 {dimension_numbers = #tpu.dot_dimension_numbers<[1], [0], [0], [1], [0, 0, 1, 1], [], []>} : vector<32x32xf32>, vector<32x256xf32>, vector<32x256xf32> -> vector<32x256xf32>
    %c0_10 = arith.constant 0 : index
    %c0_11 = arith.constant 0 : index
    %24 = vector.load %arg4[%c0_10, %c0_11] : memref<32x1xf32, #tpu.memory_space<vmem>>, vector<32x1xf32>
    %25 = vector.broadcast %24 : vector<32x1xf32> to vector<32x256xf32>
    %26 = arith.addf %23, %25 : vector<32x256xf32>
    %c0_12 = arith.constant 0 : index
    %c0_13 = arith.constant 0 : index
    %c0_14 = arith.constant 0 : index
    %27 = vector.load %arg5[%c0_12, %c0_13, %c0_14] : memref<1x32x256xf32, #tpu.memory_space<vmem>>, vector<1x32x256xf32>
    %28 = vector.shape_cast %27 : vector<1x32x256xf32> to vector<32x256xf32>
    %29 = vector.shape_cast %26 : vector<32x256xf32> to vector<1x32x256xf32>
    tpu.vector_store %arg5[%c0_12, %c0_13, %c0_14], %29 {strides = array<i32>} : memref<1x32x256xf32, #tpu.memory_space<vmem>>, vector<1x32x256xf32>,
    return
  }
  func.func @transform_0(%arg0: i32, %arg1: i32) -> (i32, i32, i32) {
    %c0_i32 = arith.constant 0 : i32
    %c0_i32_0 = arith.constant 0 : i32
    return %arg0, %c0_i32, %arg1 : i32, i32, i32
  }
  func.func @transform_1(%arg0: i32, %arg1: i32) -> (i32, i32) {
    %c0_i32 = arith.constant 0 : i32
    %c0_i32_0 = arith.constant 0 : i32
    %c0_i32_1 = arith.constant 0 : i32
    return %c0_i32, %c0_i32_0 : i32, i32
  }
  func.func @transform_2(%arg0: i32, %arg1: i32) -> (i32, i32) {
    %c0_i32 = arith.constant 0 : i32
    %c0_i32_0 = arith.constant 0 : i32
    %c0_i32_1 = arith.constant 0 : i32
    return %c0_i32, %c0_i32_0 : i32, i32
  }
  func.func @transform_3(%arg0: i32, %arg1: i32) -> (i32, i32, i32) {
    %c0_i32 = arith.constant 0 : i32
    %c0_i32_0 = arith.constant 0 : i32
    return %arg0, %c0_i32, %arg1 : i32, i32, i32
  }
}

</mosaic_0001>

<bundles_post_ra>
// kernel: tpu_custom_call.1
= control target key start
LH: loop header
LB: loop body
LE: loop exit
PB: predicated region body
PF: predicated region fallthrough
CT: control target
= control target key end

     0   :  { %8 = vsyncpa [#allocation3], 0  ;;  %s991_s0 = inlined_call_operand.hbm [shape: f32[2,32,256], index: 0, kind: input, shape index: {}]   ;;  %s992_s1 = inlined_call_operand.vmem [shape: f32[32,32], index: 1, kind: input, shape index: {}]   ;;  %s993_s2 = inlined_call_operand.vmem [shape: f32[32,1], index: 2, kind: input, shape index: {}]   ;;  %s994_s3 = inlined_call_operand.hbm [shape: f32[2,32,256], index: 3, kind: output, shape index: {}]  }
   0x1   :  { %10 = vsyncpa [#allocation3 + $0x1], 0 }
   0x2   :  { %11 = vsyncpa [#allocation4], 0 }
   0x3   :  { %13 = vsyncpa [#allocation4 + $0x1], 0  ;;  %s779_s12 = smov 0   ;;  %s781_s13 = smov 0  }
   0x4   :  { %s783_s14 = smov 0   ;;  %s785_s15 = smov 0  }
   0x5   :  { %s787_s16 = smov 0   ;;  %s789_s17 = smov 0  }
   0x6 LB: > { %s530_s18 = sadd.s32 4294967295, %s751_s17   ;;  %s531_s19 = sadd.s32 4294967294, %s751_s17   ;;  %s751_s17 = sphi %s789_s17, %s19_s17   ;;  %s747_s16 = sphi %s787_s16, %s1003_s16   ;;  %s743_s15 = sphi %s785_s15, %s1002_s15   ;;  %s739_s14 = sphi %s783_s14, %s1001_s14   ;;  %s735_s13 = sphi %s781_s13, %s1000_s13   ;;  %s731_s12 = sphi %s779_s12, %s999_s12  }
   0x7   : > { %s31_s20 = sadd.s32 1, %s747_s16  ;;  %s40_s21 = sadd.s32 1, %s739_s14 }
   0x8   : > { %p33_p0 = scmp.ge.s32.totalorder %s31_s20, 2  ;;  %p47_p1 = scmp.ne.s32.totalorder %s739_s14, %s735_s13 }
   0x9   : > { %p48_p2 = scmp.eq.s32.totalorder %s751_s17, 0  ;;  %p53_p3 = scmp.ne.s32.totalorder %s735_s13, %s731_s12 }
   0xa   : > { %s1005_s20 = smov (%p33_p0, %s31_s20), 0  ;;  %p54_p5 = scmp.eq.s32.totalorder %s530_s18, 0 }
   0xb   : > { %p820_p4 = por %p48_p2, %p47_p1  ;;  %s35_s23 = ssub.s32 %s747_s16, %s1005_s20 }
   0xc   : > { %p121_p6 = scmp.eq.s32.totalorder %s530_s18, 1  ;;  %p38_p7 = scmp.eq.s32.totalorder %s35_s23, 0 }
   0xd   : > { %p826_p8 = por %p54_p5, %p53_p3  ;;  %p127_p10 = scmp.eq.s32.totalorder %s531_s19, 1 }
   0xe   : > { %p830_p9 = por %p121_p6, %p47_p1  ;;  %p533_p12 = scmp.ge.s32.totalorder %s751_s17, 2 }
   0xf   : > { %s835_s26 = scalar_select %p38_p7, %s739_s14, %s40_s21  }
  0x10   : > { %p837_p11 = por %p127_p10, %p53_p3  ;;  %p575_p13 = scmp.lt.s32.totalorder %s751_s17, 2 }
  0x11   : > { %s153_s28 = sand.u32 1, %s739_s14   ;;  %s553_s30 = sshll.u32 %s747_s16, 6 }
  0x12   : > { %s534_s29 = sshll.u32 %s153_s28, 6  ;;  %s164_s6 = scalar_lea.hbm %s991_s0, %s553_s30 }
  0x13   : > { %s157_s7 = scalar_lea.vmem [#allocation2], %s534_s29  ;;  %s165_s9 = sshll.u32 %s164_s6, 4  ;;  %s166_s9 = int_to_ptr.hbm [resolvable:$true] %s165_s9 }
  0x14   : > { %s167_s8 = sshll.u32 %s157_s7, 4  ;;  %p568_p0 = pnand %p575_p13, %p820_p4  ;;  %s168_s8 = int_to_ptr.vmem [resolvable:$true] %s167_s8 }
  0x15   : > { %p537_p1 = scmp.ge.s32.totalorder %s751_s17, 1  ;;  %s154_s10 = scalar_lea.sflag [#allocation3], %s153_s28 }
  0x16   : > { %s753_s11 = smov 256   ;;  %s754_s18 = smov 16  }
  0x17   : > { %570 = dma.hbm_to_vmem [thread:$0]  (!%p568_p0), %s166_s9, 1024, %s168_s8, %s154_s10, %s753_s11, %s753_s11, %s754_s18  }
  0x18   : > { %p175_p2 = scmp.lt.s32.totalorder %s751_s17, 3 }
  0x1a   : > { %p176_p3 = pnand %p537_p1, %p175_p2 }
  0x1b   : > { %s853_s19 = sand.u32 (!%p176_p3), 1, %s735_s13  }
  0x1c   : > { %179 = sbr.rel (%p176_p3) target bundleno = 239 (0xef), region = 32  ;;  %s538_s21 = sshll.u32 (!%p176_p3), %s853_s19, 6 }
  0x1d   : > { %s182_s23 = scalar_lea.sflag (!%p176_p3), [#allocation3], %s853_s19  ;;  %s185_s22 = scalar_lea.vmem (!%p176_p3), [#allocation2], %s538_s21 }
  0x21   : > { %722 = dma.done.wait (%p826_p8), %s182_s23, 1024  }
  0x22   : > { %724 = vsyncadd (%p826_p8), %s182_s23, 4294966272  ;;  %v755_v0 = vmov 32.0   ;;  %v863_v2 = vld [vmem:[%s185_s22] sm:$0xff]  ;;  %v865_v3 = vld [vmem:[%s185_s22 + $0x10] sm:$0xff]  ;;  %vm346_vm7 = vcmask 261120   ;;  %s208_s28 = scalar_lea.vmem [#allocation5], %s538_s21 }
  0x23   : > { %633 = vrcp.f32 %v755_v0  ;;  %v867_v4 = vld [vmem:[%s185_s22 + $0x20] sm:$0xff]  ;;  %v869_v5 = vld [vmem:[%s185_s22 + $0x30] sm:$0xff]  ;;  %v219_v6 = vadd.f32 %v865_v3, %v863_v2  ;;  %v246_v8 = vmul.f32 %v863_v2, %v863_v2  ;;  %v875_v9 = vld [vmem:[%s185_s22 + $0x8] sm:$0xff]  ;;  %v248_v11 = vmul.f32 %v865_v3, %v865_v3  ;;  %s554_s29 = sshll.u32 %s743_s15, 6  ;;  %s440_s21 = sshll.u32 %s208_s28, 4  ;;  %s441_s21 = int_to_ptr.vmem [resolvable:$true] %s440_s21 }
  0x24   : > { %v877_v10 = vld [vmem:[%s185_s22 + $0x18] sm:$0xff]  ;;  %v250_v12 = vmul.f32 %v867_v4, %v867_v4  ;;  %v883_v13 = vld [vmem:[%s185_s22 + $0x28] sm:$0xff]  ;;  %v252_v17 = vmul.f32 %v869_v5, %v869_v5  ;;  %v247_v18 = vmul.f32 %v875_v9, %v875_v9  ;;  %s439_s5 = scalar_lea.hbm %s994_s3, %s554_s29  ;;  %s426_s6 = scalar_lea.sflag [#allocation4], %s853_s19 }
  0x25   : > { %v885_v14 = vld [vmem:[%s185_s22 + $0x38] sm:$0xff]  ;;  %v228_v15 = vadd.f32 %v877_v10, %v875_v9  ;;  %v220_v16 = vadd.f32 %v219_v6, %v867_v4  ;;  %v249_v19 = vmul.f32 %v877_v10, %v877_v10  ;;  %v254_v21 = vadd.f32 %v248_v11, %v246_v8  ;;  %s442_s15 = sshll.u32 %s439_s5, 4  ;;  %s689_s11 = scalar_lea.hbm %s994_s3, 128  ;;  %s443_s15 = int_to_ptr.hbm [resolvable:$true] %s442_s15 }
  0x26   : > { %v251_v23 = vmul.f32 %v883_v13, %v883_v13  ;;  %v253_v25 = vmul.f32 %v885_v14, %v885_v14  ;;  %s683_s7 = sshra.s32 %s443_s15, 4  ;;  %s684_s7 = int_to_ptr.hbm [resolvable:$true] %s683_s7 }
  0x27   : > { %v229_v22 = vadd.f32 %v228_v15, %v883_v13  ;;  %v221_v24 = vadd.f32 %v220_v16, %v869_v5  ;;  %v263_v26 = vadd.f32 %v249_v19, %v247_v18  ;;  %v255_v27 = vadd.f32 %v254_v21, %v250_v12  ;;  %v324_v16 = vld [vmem:[%s993_s2 + $0x10] sm:$0xff]  ;;  %s685_s8 = scalar_lea.hbm %s684_s7, 64  ;;  %p690_p7 = scmp.lt.s32.totalorder %s684_s7, %s994_s3 }
  0x28   : > { %v756_v12 = vmov 0   ;;  %p686_p4 = scmp.ne.s32.totalorder %s684_s7, %s685_s8  ;;  %p691_p8 = scmp.lt.s32.totalorder %s689_s11, %s685_s8 }
  0x29   : > { %v634_v1 = vpop.eup %633  ;;  %v230_v28 = vadd.f32 %v229_v22, %v885_v14  ;;  %v222_v29 = vrot.slane %v221_v24, 4  ;;  %v264_v30 = vadd.f32 %v263_v26, %v251_v23  ;;  %v256_v32 = vadd.f32 %v255_v27, %v252_v17  ;;  %632 = vset.pattern.permute.xlu1 %v756_v12  ;;  %631 = vset.pattern.permute.xlu0 %v756_v12  ;;  %v322_v17 = vld [vmem:[%s993_s2] sm:$0xff]  ;;  %v323_v26 = vld [vmem:[%s993_s2 + $0x8] sm:$0xff] }
  0x2a   : > { %v238_v7 = vmul.f32 32.0, %v634_v1  ;;  %vm242_vm0 = vweird.f32 %v634_v1  ;;  %338 = vperm.xlu1 %632, %v324_v16   ;;  %328 = vperm.xlu0 %631, %v322_v17   ;;  %p687_p5 = pnand %p686_p4, %p830_p9  ;;  %p692_p10 = por %p691_p8, %p690_p7 }
  0x2b   : > { %v231_v33 = vrot.slane %v230_v28, 4  ;;  %v223_v34 = vadd.f32 %v222_v29, %v221_v24  ;;  %v265_v35 = vadd.f32 %v264_v30, %v253_v25  ;;  %v257_v36 = vrot.slane %v256_v32, 4  ;;  %v325_v25 = vld [vmem:[%s993_s2 + $0x18] sm:$0xff] }
  0x2c   : > { %v239_v20 = vsub.f32 1.0, %v238_v7  ;;  %p688_p6 = pneg %p687_p5 }
  0x2d   : > { %v232_v37 = vadd.f32 %v231_v33, %v230_v28  ;;  %v224_v38 = vrot.slane %v223_v34, 2  ;;  %v266_v39 = vrot.slane %v265_v35, 4  ;;  %v258_v41 = vadd.f32 %v257_v36, %v256_v32 }
  0x2e   : > { %v240_v31 = vmul.f32 %v634_v1, %v239_v20  ;;  %p693_p13 = pnand %p692_p10, %p688_p6 }
  0x2f   : > { %v233_v42 = vrot.slane %v232_v37, 2  ;;  %v225_v43 = vadd.f32 %v224_v38, %v223_v34  ;;  %v267_v44 = vadd.f32 %v266_v39, %v265_v35  ;;  %v259_v45 = vrot.slane %v258_v41, 2 }
  0x30   : > { %v241_v40 = vadd.f32 %v634_v1, %v240_v31 }
  0x31   : > { %v234_v46 = vadd.f32 %v233_v42, %v232_v37  ;;  %v226_v47 = vrot.slane %v225_v43, 1  ;;  %v268_v48 = vrot.slane %v267_v44, 2  ;;  %v260_v50 = vadd.f32 %v259_v45, %v258_v41  ;;  %v321_v45 = vld [vmem:[%s992_s1 + $0x18] sm:$0xff] }
  0x32   : > { %v243_v49 = vsel %vm242_vm0, %v634_v1, %v241_v40  ;;  %343 = vperm.xlu1 %632, %v325_v25   ;;  %333 = vperm.xlu0 %631, %v323_v26  }
  0x33   : > { %v235_v51 = vrot.slane %v234_v46, 1  ;;  %v227_v52 = vadd.f32 %v226_v47, %v225_v43  ;;  %v269_v53 = vadd.f32 %v268_v48, %v267_v44  ;;  %v261_v54 = vrot.slane %v260_v50, 1  ;;  %v319_v44 = vld [vmem:[%s992_s1 + $0x8] sm:$0xff] }
  0x35   : > { %v236_v55 = vadd.f32 %v235_v51, %v234_v46  ;;  %v903_v56 = vmul.f32 %v243_v49, %v227_v52  ;;  %v270_v57 = vrot.slane %v269_v53, 1  ;;  %v262_v58 = vadd.f32 %v261_v54, %v260_v50 }
  0x37   : > { %v905_v59 = vmul.f32 %v243_v49, %v236_v55  ;;  %v274_v60 = vmul.f32 %v903_v56, %v903_v56  ;;  %v271_v61 = vadd.f32 %v270_v57, %v269_v53  ;;  %v272_v62 = vmul.f32 %v262_v58, %v243_v49 }
  0x38   : > { %v308_v29 = vsub.f32 %v869_v5, %v903_v56  ;;  %v306_v31 = vsub.f32 %v867_v4, %v903_v56  ;;  %v304_v36 = vsub.f32 %v865_v3, %v903_v56  ;;  %v302_v40 = vsub.f32 %v863_v2, %v903_v56  ;;  %v318_v2 = vld [vmem:[%s992_s1] sm:$0xff] }
  0x39   : > { %v275_v63 = vmul.f32 %v905_v59, %v905_v59  ;;  %v273_v0 = vmul.f32 %v271_v61, %v243_v49  ;;  %v276_v1 = vsub.f32 %v272_v62, %v274_v60  ;;  %v309_v33 = vsub.f32 %v885_v14, %v905_v59 }
  0x3a   : > { %v307_v34 = vsub.f32 %v883_v13, %v905_v59  ;;  %v305_v5 = vsub.f32 %v877_v10, %v905_v59  ;;  %v303_v14 = vsub.f32 %v875_v9, %v905_v59  ;;  %v320_v9 = vld [vmem:[%s992_s1 + $0x10] sm:$0xff] }
  0x3b   : > { %v277_v6 = vsub.f32 %v273_v0, %v275_v63  ;;  %v278_v7 = vmax.f32 %v276_v1, 0.0 }
  0x3d   : > { %v279_v8 = vmax.f32 %v277_v6, 0.0  ;;  %v280_v11 = vadd.f32 1e-05, %v278_v7 }
  0x3f   : > { %v281_v15 = vadd.f32 1e-05, %v279_v8  ;;  %635 = vrsqrt.f32 %v280_v11  ;;  %vm288_vm1 = vweird.f32 %v280_v11 }
  0x41   : > { %637 = vrsqrt.f32 %v281_v15  ;;  %vm298_vm3 = vweird.f32 %v281_v15 }
  0x45   : > { %v636_v18 = vpop.eup %635 }
  0x46   : > { %v283_v20 = vmul.f32 %v636_v18, %v280_v11  ;;  %vm289_vm2 = vweird.f32 %v636_v18 }
  0x47   : > { %v638_v19 = vpop.eup %637  ;;  %vm290_vm5 = vmor %vm288_vm1, %vm289_vm2 }
  0x48   : > { %v293_v21 = vmul.f32 %v638_v19, %v281_v15  ;;  %v284_v22 = vmul.f32 %v636_v18, %v283_v20  ;;  %vm299_vm4 = vweird.f32 %v638_v19 }
  0x49   : > { %vm300_vm6 = vmor %vm298_vm3, %vm299_vm4 }
  0x4a   : > { %v294_v23 = vmul.f32 %v638_v19, %v293_v21  ;;  %v285_v24 = vmul.f32 0.5, %v284_v22 }
  0x4c   : > { %v295_v27 = vmul.f32 0.5, %v294_v23  ;;  %v286_v28 = vsub.f32 1.5, %v285_v24 }
  0x4e   : > { %v296_v30 = vsub.f32 1.5, %v295_v27  ;;  %v287_v32 = vmul.f32 %v636_v18, %v286_v28 }
  0x50   : > { %v297_v35 = vmul.f32 %v638_v19, %v296_v30  ;;  %v291_v37 = vsel %vm290_vm5, %v636_v18, %v287_v32 }
  0x51   : > { %v316_v38 = vmul.f32 %v308_v29, %v291_v37  ;;  %v314_v39 = vmul.f32 %v306_v31, %v291_v37  ;;  %v312_v13 = vmul.f32 %v304_v36, %v291_v37  ;;  %v310_v10 = vmul.f32 %v302_v40, %v291_v37 }
  0x52   : > { %v301_v4 = vsel %vm300_vm6, %v638_v19, %v297_v35 }
  0x53   : > { %v317_v41 = vmul.f32 %v309_v33, %v301_v4  ;;  %v315_v42 = vmul.f32 %v307_v34, %v301_v4  ;;  %371 = vmatpush.msra.mxu0 %v316_v38  ;;  %555 = vmatpush.msra.mxu2 %v316_v38  ;;  %v313_v3 = vmul.f32 %v305_v5, %v301_v4 }
  0x54   : > { %v311_v43 = vmul.f32 %v303_v14, %v301_v4 }
  0x55   : > { %400 = vmatpush.msra.mxu1 %v317_v41  ;;  %559 = vmatpush.msra.mxu3 %v317_v41 }
  0x56   : > { %372 = vmatpush.msra.mxu0 %v314_v39  ;;  %556 = vmatpush.msra.mxu2 %v314_v39 }
  0x57   : > { %401 = vmatpush.msra.mxu1 %v315_v42  ;;  %560 = vmatpush.msra.mxu3 %v315_v42 }
  0x58   : > { %373 = vmatpush.msra.mxu0 %v312_v13  ;;  %557 = vmatpush.msra.mxu2 %v312_v13 }
  0x59   : > { %402 = vmatpush.msra.mxu1 %v313_v3  ;;  %561 = vmatpush.msra.mxu3 %v313_v3 }
  0x5a   : > { %374 = vmatpush.msra.mxu0 %v310_v10  ;;  %558 = vmatpush.msra.mxu2 %v310_v10 }
  0x5b   : > { %403 = vmatpush.msra.mxu1 %v311_v43  ;;  %562 = vmatpush.msra.mxu3 %v311_v43 }
  0x5c   : > { %540 = vmatmul.msk.f32.vlgmr.msra.gmra.mxu0 %vm346_vm7, %v318_v2  ;;  %542 = vmatmul.msk.f32.vlgmr.msra.gmra.mxu2 %vm346_vm7, %v320_v9 }
  0x5d   : > { %544 = vmatmul.msk.f32.vlgmr.msra.gmra.mxu1 %vm346_vm7, %v318_v2  ;;  %546 = vmatmul.msk.f32.vlgmr.msra.gmra.mxu3 %vm346_vm7, %v320_v9 }
  0x64   : > { %541 = vmatmul.msk.f32.gmra.mxu0 %vm346_vm7, %v319_v44  ;;  %543 = vmatmul.msk.f32.gmra.mxu2 %vm346_vm7, %v321_v45 }
  0x65   : > { %545 = vmatmul.msk.f32.gmra.mxu1 %vm346_vm7, %v319_v44  ;;  %547 = vmatmul.msk.f32.gmra.mxu3 %vm346_vm7, %v321_v45 }
  0x9c   : > { %v329_v46 = vpop.permute.xlu0 %328  ;;  %v339_v51 = vpop.permute.xlu1 %338 }
  0xa4   : > { %v334_v55 = vpop.permute.xlu0 %333  ;;  %v344_v61 = vpop.permute.xlu1 %343 }
  0xd9   : > { %v376_v47 = vpop.f32.mrf.mxu0 }
  0xda   : > { %v377_v48 = vadd.f32 %v376_v47, %v329_v46  ;;  %v405_v49 = vpop.f32.mrf.mxu1 }
  0xdb   : > { %v406_v50 = vadd.f32 %v405_v49, %v329_v46 }
  0xdc   : > { %417 = vst [vmem:[%s208_s28] sm:$0xff] %v377_v48 }
  0xdd   : > { %418 = vst [vmem:[%s208_s28 + $0x8] sm:$0xff] %v406_v50 }
  0xdf   : > { %v382_v52 = vpop.f32.mrf.mxu2 }
  0xe0   : > { %v383_v53 = vadd.f32 %v382_v52, %v339_v51  ;;  %v411_v54 = vpop.f32.mrf.mxu3 }
  0xe1   : > { %v412_v56 = vadd.f32 %v411_v54, %v339_v51  ;;  %v379_v57 = vpop.f32.mrf.mxu0 }
  0xe2   : > { %421 = vst [vmem:[%s208_s28 + $0x20] sm:$0xff] %v383_v53  ;;  %v380_v58 = vadd.f32 %v379_v57, %v334_v55  ;;  %v408_v59 = vpop.f32.mrf.mxu1 }
  0xe3   : > { %422 = vst [vmem:[%s208_s28 + $0x28] sm:$0xff] %v412_v56  ;;  %v409_v60 = vadd.f32 %v408_v59, %v334_v55 }
  0xe4   : > { %419 = vst [vmem:[%s208_s28 + $0x10] sm:$0xff] %v380_v58 }
  0xe5   : > { %420 = vst [vmem:[%s208_s28 + $0x18] sm:$0xff] %v409_v60 }
  0xe7   : > { %v385_v62 = vpop.f32.mrf.mxu2 }
  0xe8   : > { %v386_v63 = vadd.f32 %v385_v62, %v344_v61  ;;  %v414_v0 = vpop.f32.mrf.mxu3 }
  0xe9   : > { %v415_v1 = vadd.f32 %v414_v0, %v344_v61 }
  0xea   : > { %423 = vst [vmem:[%s208_s28 + $0x30] sm:$0xff] %v386_v63 }
  0xeb   : > { %424 = vst [vmem:[%s208_s28 + $0x38] sm:$0xff] %v415_v1 }
  0xec   : > { %696 = shalt.err (!%p693_p13)
}
  0xed   : > { %s757_s19 = smov 256   ;;  %s758_s22 = smov 16  }
  0xee   : > { %565 = dma.vmem_to_hbm [thread:$0]  (%p830_p9), %s441_s21, 1024, %s443_s15, %s426_s6, %s757_s19, %s757_s19, %s758_s22  }
  0xef PF: > { %s457_s24 = sand.u32 1, %s731_s12   ;;  %p572_p0 = pnand %p533_p12, %p837_p11 }
  0xf0   : > { %s458_s28 = scalar_lea.sflag [#allocation4], %s457_s24 }
  0xf1   : > { %p573_p1 = pneg %p572_p0 }
  0xf3   : > { %726 = dma.done.wait (%p573_p1), %s458_s28, 1024  }
  0xf4   : > { %728 = vsyncadd (%p573_p1), %s458_s28, 4294966272  ;;  %s19_s17 = sadd.s32 1, %s751_s17   ;;  %s999_s12 = smov %s735_s13 }
  0xf5   : > { %p16_p2 = scmp.ge.s32.totalorder %s19_s17, 4   ;;  %s1000_s13 = smov %s739_s14 }
  0xf6   : > { %s1001_s14 = smov %s835_s26  ;;  %s1002_s15 = smov %s747_s16 }
  0xf7   : > { %s1003_s16 = smov %s1005_s20  ;;  %18 = sbr.rel (!%p16_p2) target bundleno = 6 (0x6), region = 77 }
  0xfc   :  { %464 = vsyncpa [#allocation3], 1 }
  0xfd   :  { %466 = vsyncpa [#allocation3 + $0x1], 1 }
  0xfe   :  { %467 = vsyncpa [#allocation4], 1 }
  0xff   :  { %469 = vsyncpa [#allocation4 + $0x1], 1 }

</bundles_post_ra>
